<compile_context>
chip_gen: v6e
topology: v6e:2x2x1
jax: 0.10.0
libtpu: 0.0.40
codegen_flags: <defaults>
</compile_context>

<pallas_src>
import jax
import jax.numpy as jnp
from jax.experimental import pallas as pl
from jax.experimental.pallas import tpu as pltpu


def attention_kernel(hid_ref, enc_ref, wah_ref, wae_ref, ba_ref, vw_ref,
                     out_ref, eproj_ref):
    """hid_ref : (B, H)      decoder hidden (seq dim squeezed in wrapper)
    enc_ref : (S*B, 2H)      encoder outputs, flat in original seq-major order
    wah_ref : (H, H)         attn weight, hidden part, pre-transposed (x @ W)
    wae_ref : (2H, H)        attn weight, encoder part, pre-transposed
    ba_ref  : (1, H)         attn bias
    vw_ref  : (1, H)         v weight as a lane row
    out_ref : (S, B)         softmax over axis 0 (seq)
    eproj_ref: (S*B, H) VMEM scratch for the batched encoder projection
    """
    B = hid_ref.shape[0]
    S = out_ref.shape[0]

    # Hidden projection + bias: constant over seq, one tiny matmul for all b.
    hid_proj = (
        jnp.dot(hid_ref[...], wah_ref[...], preferred_element_type=jnp.float32)
        + ba_ref[...]
    )                                                              # (B, H)

    # One batched MXU matmul over every (s, b) row.
    eproj_ref[...] = jnp.dot(
        enc_ref[...], wae_ref[...], preferred_element_type=jnp.float32
    )                                                              # (S*B, H)

    vw = vw_ref[...]                                               # (1, H), hoisted
    cols = []
    for b in range(B):  # B is tiny & static; rows of batch b sit at stride B
        e_b = eproj_ref[pl.ds(b, S, stride=B), :]                  # (S, H)
        energy = jnp.tanh(e_b + hid_proj[b:b + 1, :])              # (S, H)
        # v-projection: VPU multiply + lane reduction (no N=1 MXU matmul).
        scores = jnp.sum(energy * vw, axis=1, keepdims=True)       # (S, 1)
        # softmax over the sequence axis (v bias dropped: cancels in softmax)
        m = jnp.max(scores, axis=0, keepdims=True)
        e = jnp.exp(scores - m)
        denom = jnp.sum(e, axis=0, keepdims=True)
        cols.append(e * pl.reciprocal(denom, approx=True))         # (S, 1)

    # Single store of the whole (S, B) tile.
    out_ref[...] = jnp.concatenate(cols, axis=1).astype(out_ref.dtype)


def attention_forward(hidden, encoder_outputs, params):
    """hidden: (1, B, H), encoder_outputs: (S, B, 2H) -> (S, B) softmax over S."""
    S, B, twoH = encoder_outputs.shape
    H = hidden.shape[-1]

    # Free, contiguous reshapes only — no HBM broadcast / concat / transpose.
    hid2d = hidden.reshape(B, H)                                   # (B, H)
    enc_flat = encoder_outputs.reshape(S * B, twoH)                # (S*B, 2H)

    # Split attn weight so the (S,B,3H) concat never materializes.
    wa_hid_t = params["attn_w"][:, :H].T                           # (H, H)
    wa_enc_t = params["attn_w"][:, H:].T                           # (2H, H)
    ba = params["attn_b"].reshape(1, H)                            # (1, H)
    vw_row = params["v_w"].reshape(1, H)                           # (1, H)
    # v bias intentionally not passed: uniform shift cancels in softmax.

    vmem = pl.BlockSpec(memory_space=pltpu.MemorySpace.VMEM)
    out = pl.pallas_call(
        attention_kernel,
        out_shape=jax.ShapeDtypeStruct((S, B), jnp.float32),
        in_specs=[vmem] * 6,
        out_specs=vmem,
        scratch_shapes=[pltpu.VMEM((S * B, H), jnp.float32)],
    )(hid2d, enc_flat, wa_hid_t, wa_enc_t, ba, vw_row)
    return out


def attention_ref(hidden, encoder_outputs, params):
    """Pure-JAX reference matching the PyTorch forward exactly."""
    S = encoder_outputs.shape[0]
    hid = jnp.broadcast_to(hidden, (S,) + hidden.shape[1:])
    cat = jnp.concatenate([hid, encoder_outputs], axis=2)
    energy = jnp.tanh(cat @ params["attn_w"].T + params["attn_b"])
    attention = (energy @ params["v_w"].T + params["v_b"])[..., 0]
    return jax.nn.softmax(attention, axis=0)


def init_params(key, hid_dim):
    """Deterministic init mirroring nn.Linear's U(-1/sqrt(fan_in), 1/sqrt(fan_in))."""
    k1, k2, k3, k4 = jax.random.split(key, 4)
    fan_attn = 3 * hid_dim
    b_attn = 1.0 / jnp.sqrt(fan_attn)
    b_v = 1.0 / jnp.sqrt(hid_dim)
    return {
        "attn_w": jax.random.uniform(k1, (hid_dim, 3 * hid_dim), jnp.float32, -b_attn, b_attn),
        "attn_b": jax.random.uniform(k2, (hid_dim,), jnp.float32, -b_attn, b_attn),
        "v_w": jax.random.uniform(k3, (1, hid_dim), jnp.float32, -b_v, b_v),
        "v_b": jax.random.uniform(k4, (1,), jnp.float32, -b_v, b_v),
    }


if __name__ == "__main__":
    S, B, H = 8, 2, 32  # seq_len, batch, hid_dim

    key = jax.random.PRNGKey(0)
    k_p, k_h, k_e = jax.random.split(key, 3)
    params = init_params(k_p, H)
    hidden = jax.random.normal(k_h, (1, B, H), jnp.float32)               # decoder hidden
    encoder_outputs = jax.random.normal(k_e, (S, B, 2 * H), jnp.float32)  # bidirectional enc

    out = attention_forward(hidden, encoder_outputs, params)
    out = jax.block_until_ready(out)

    ref = attention_ref(hidden, encoder_outputs, params)
    assert out.shape == (S, B), out.shape

    # Tight check modulo the approximate reciprocal: renormalizing each column
    # cancels the (column-constant) EUP-approx factor exactly, so everything
    # upstream of the final normalize must match to f32 precision.
    renorm = out / jnp.sum(out, axis=0, keepdims=True)
    assert jnp.allclose(renorm, ref, atol=1e-5, rtol=1e-5), "mismatch vs reference"

    # Raw output: accuracy limited only by pl.reciprocal(approx=True) (~2^-12 rel).
    assert jnp.allclose(out, ref, atol=5e-3, rtol=5e-3), "raw mismatch vs reference"
    assert jnp.allclose(jnp.sum(out, axis=0), jnp.ones((B,)), atol=5e-3)

    print("KERNEL_OK")
</pallas_src>

<mosaic_0001>
module attributes {stable_mosaic.version = 11 : i64} {
  func.func @attention_kernel(%arg0: memref<2x32xf32, #tpu.memory_space<vmem>>, %arg1: memref<16x64xf32, #tpu.memory_space<vmem>>, %arg2: memref<32x32xf32, #tpu.memory_space<vmem>>, %arg3: memref<64x32xf32, #tpu.memory_space<vmem>>, %arg4: memref<1x32xf32, #tpu.memory_space<vmem>>, %arg5: memref<1x32xf32, #tpu.memory_space<vmem>>, %arg6: memref<8x2xf32, #tpu.memory_space<vmem>>, %arg7: memref<16x32xf32, #tpu.memory_space<vmem>>) attributes {dimension_semantics = [], scalar_prefetch = 0 : i64, scratch_operands = 1 : i64, tpu.core_type = #tpu.core_type<tc>} {
    %c0 = arith.constant 0 : index
    %c0_0 = arith.constant 0 : index
    %0 = vector.load %arg0[%c0, %c0_0] : memref<2x32xf32, #tpu.memory_space<vmem>>, vector<2x32xf32>
    %c0_1 = arith.constant 0 : index
    %c0_2 = arith.constant 0 : index
    %1 = vector.load %arg2[%c0_1, %c0_2] : memref<32x32xf32, #tpu.memory_space<vmem>>, vector<32x32xf32>
    %cst = arith.constant dense<0.000000e+00> : vector<2x32xf32>
    %2 = tpu.matmul %0, %1, %cst {dimension_numbers = #tpu.dot_dimension_numbers<[1], [0], [0], [1], [0, 0, 1, 1], [], []>} : vector<2x32xf32>, vector<32x32xf32>, vector<2x32xf32> -> vector<2x32xf32>
    %c0_3 = arith.constant 0 : index
    %c0_4 = arith.constant 0 : index
    %3 = vector.load %arg4[%c0_3, %c0_4] : memref<1x32xf32, #tpu.memory_space<vmem>>, vector<1x32xf32>
    %4 = vector.broadcast %3 : vector<1x32xf32> to vector<2x32xf32>
    %5 = arith.addf %2, %4 : vector<2x32xf32>
    %c0_5 = arith.constant 0 : index
    %c0_6 = arith.constant 0 : index
    %6 = vector.load %arg1[%c0_5, %c0_6] : memref<16x64xf32, #tpu.memory_space<vmem>>, vector<16x64xf32>
    %c0_7 = arith.constant 0 : index
    %c0_8 = arith.constant 0 : index
    %7 = vector.load %arg3[%c0_7, %c0_8] : memref<64x32xf32, #tpu.memory_space<vmem>>, vector<64x32xf32>
    %cst_9 = arith.constant dense<0.000000e+00> : vector<16x32xf32>
    %8 = tpu.matmul %6, %7, %cst_9 {dimension_numbers = #tpu.dot_dimension_numbers<[1], [0], [0], [1], [0, 0, 1, 1], [], []>} : vector<16x64xf32>, vector<64x32xf32>, vector<16x32xf32> -> vector<16x32xf32>
    %c0_10 = arith.constant 0 : index
    %c0_11 = arith.constant 0 : index
    %9 = vector.load %arg7[%c0_10, %c0_11] : memref<16x32xf32, #tpu.memory_space<vmem>>, vector<16x32xf32>
    tpu.vector_store %arg7[%c0_10, %c0_11], %8 {strides = array<i32>} : memref<16x32xf32, #tpu.memory_space<vmem>>, vector<16x32xf32>,
    %c0_12 = arith.constant 0 : index
    %c0_13 = arith.constant 0 : index
    %10 = vector.load %arg5[%c0_12, %c0_13] : memref<1x32xf32, #tpu.memory_space<vmem>>, vector<1x32xf32>
    %c0_14 = arith.constant 0 : index
    %c0_15 = arith.constant 0 : index
    %11 = tpu.strided_load %arg7[%c0_14, %c0_15] {strides = array<i32: 2, 1>} : memref<16x32xf32, #tpu.memory_space<vmem>>, vector<8x32xf32>
    %12 = vector.extract_strided_slice %5 {offsets = [0, 0], sizes = [1, 32], strides = [1, 1]} : vector<2x32xf32> to vector<1x32xf32>
    %13 = vector.broadcast %12 : vector<1x32xf32> to vector<8x32xf32>
    %14 = arith.addf %11, %13 : vector<8x32xf32>
    %15 = math.tanh %14 : vector<8x32xf32>
    %16 = vector.broadcast %10 : vector<1x32xf32> to vector<8x32xf32>
    %17 = arith.mulf %15, %16 : vector<8x32xf32>
    %cst_16 = arith.constant dense<0.000000e+00> : vector<8xf32>
    %18 = vector.multi_reduction <add>, %17, %cst_16 [1] : vector<8x32xf32> to vector<8xf32>
    %19 = vector.shape_cast %18 : vector<8xf32> to vector<8x1xf32>
    %cst_17 = arith.constant dense<0xFF800000> : vector<1xf32>
    %20 = vector.multi_reduction <maximumf>, %19, %cst_17 [0] : vector<8x1xf32> to vector<1xf32>
    %21 = vector.shape_cast %20 : vector<1xf32> to vector<1x1xf32>
    %22 = vector.broadcast %21 : vector<1x1xf32> to vector<8x1xf32>
    %23 = arith.subf %19, %22 : vector<8x1xf32>
    %24 = math.exp %23 : vector<8x1xf32>
    %cst_18 = arith.constant dense<0.000000e+00> : vector<1xf32>
    %25 = vector.multi_reduction <add>, %24, %cst_18 [0] : vector<8x1xf32> to vector<1xf32>
    %26 = vector.shape_cast %25 : vector<1xf32> to vector<1x1xf32>
    %27 = tpu.reciprocal %26 {approx = true} : vector<1x1xf32> -> vector<1x1xf32>
    %28 = vector.broadcast %27 : vector<1x1xf32> to vector<8x1xf32>
    %29 = arith.mulf %24, %28 : vector<8x1xf32>
    %c1 = arith.constant 1 : index
    %c0_19 = arith.constant 0 : index
    %30 = tpu.strided_load %arg7[%c1, %c0_19] {strides = array<i32: 2, 1>} : memref<16x32xf32, #tpu.memory_space<vmem>>, vector<8x32xf32>
    %31 = vector.extract_strided_slice %5 {offsets = [1, 0], sizes = [1, 32], strides = [1, 1]} : vector<2x32xf32> to vector<1x32xf32>
    %32 = vector.broadcast %31 : vector<1x32xf32> to vector<8x32xf32>
    %33 = arith.addf %30, %32 : vector<8x32xf32>
    %34 = math.tanh %33 : vector<8x32xf32>
    %35 = vector.broadcast %10 : vector<1x32xf32> to vector<8x32xf32>
    %36 = arith.mulf %34, %35 : vector<8x32xf32>
    %cst_20 = arith.constant dense<0.000000e+00> : vector<8xf32>
    %37 = vector.multi_reduction <add>, %36, %cst_20 [1] : vector<8x32xf32> to vector<8xf32>
    %38 = vector.shape_cast %37 : vector<8xf32> to vector<8x1xf32>
    %cst_21 = arith.constant dense<0xFF800000> : vector<1xf32>
    %39 = vector.multi_reduction <maximumf>, %38, %cst_21 [0] : vector<8x1xf32> to vector<1xf32>
    %40 = vector.shape_cast %39 : vector<1xf32> to vector<1x1xf32>
    %41 = vector.broadcast %40 : vector<1x1xf32> to vector<8x1xf32>
    %42 = arith.subf %38, %41 : vector<8x1xf32>
    %43 = math.exp %42 : vector<8x1xf32>
    %cst_22 = arith.constant dense<0.000000e+00> : vector<1xf32>
    %44 = vector.multi_reduction <add>, %43, %cst_22 [0] : vector<8x1xf32> to vector<1xf32>
    %45 = vector.shape_cast %44 : vector<1xf32> to vector<1x1xf32>
    %46 = tpu.reciprocal %45 {approx = true} : vector<1x1xf32> -> vector<1x1xf32>
    %47 = vector.broadcast %46 : vector<1x1xf32> to vector<8x1xf32>
    %48 = arith.mulf %43, %47 : vector<8x1xf32>
    %49 = tpu.concatenate %29, %48 in 1 : vector<8x1xf32>, vector<8x1xf32> -> vector<8x2xf32>
    %c0_23 = arith.constant 0 : index
    %c0_24 = arith.constant 0 : index
    %50 = vector.load %arg6[%c0_23, %c0_24] : memref<8x2xf32, #tpu.memory_space<vmem>>, vector<8x2xf32>
    tpu.vector_store %arg6[%c0_23, %c0_24], %49 {strides = array<i32>} : memref<8x2xf32, #tpu.memory_space<vmem>>, vector<8x2xf32>,
    return
  }
}

</mosaic_0001>

<bundles_post_ra>
// kernel: tpu_custom_call.1
= control target key start
LH: loop header
LB: loop body
LE: loop exit
PB: predicated region body
PF: predicated region fallthrough
CT: control target
= control target key end

     0   :  { %v339_v2 = vmov 0.0   ;;  %vm340_vm0 = vmmov 0   ;;  %vm119_vm1 = vcmask 523264   ;;  %vm35_vm2 = vcmask 261120   ;;  %s437_s3 = inlined_call_operand.vmem [shape: f32[64,32], index: 3, kind: input, shape index: {}]   ;;  %s438_s2 = inlined_call_operand.vmem [shape: f32[32,32], index: 2, kind: input, shape index: {}]   ;;  %s439_s1 = inlined_call_operand.vmem [shape: f32[16,64], index: 1, kind: input, shape index: {}]   ;;  %s440_s0 = inlined_call_operand.vmem [shape: f32[2,32], index: 0, kind: input, shape index: {}]   ;;  %s441_s4 = inlined_call_operand.vmem [shape: f32[1,32], index: 4, kind: input, shape index: {}]   ;;  %s442_s5 = inlined_call_operand.vmem [shape: f32[1,32], index: 5, kind: input, shape index: {}]   ;;  %s443_s6 = inlined_call_operand.vmem [shape: f32[8,2], index: 6, kind: output, shape index: {}]  }
   0x1   :  { %v118_v0 = vld [vmem:[%s437_s3 + $0x38] sm:$0xff]  ;;  %v117_v1 = vld [vmem:[%s437_s3 + $0x30] sm:$0xff]  ;;  %295 = vmatprep.subr.mxu0 %v339_v2  ;;  %303 = vmatprep.mubr.msk.f32.mxu0 %vm340_vm0, %v339_v2  ;;  %v116_v3 = vld [vmem:[%s437_s3 + $0x28] sm:$0xff]  ;;  %v205_v17 = vlaneseq  ;;  %vm267_vm3 = vcmask 7168   ;;  %vm269_vm4 = vcmask 15360  }
   0x2   :  { %306 = vmatprep.subr.mxu1 %v118_v0  ;;  %v27_v4 = vld [vmem:[%s438_s2 + $0x18] sm:$0xff]  ;;  %v26_v5 = vld [vmem:[%s438_s2 + $0x10] sm:$0xff]  ;;  %v109_v6 = vld [vmem:[%s439_s1] sm:$0xff] }
   0x3   :  { %307 = vmatpush3.msra.mxu1 %v118_v0  ;;  %296 = vmatpush3.msra.mxu0 %v27_v4  ;;  %v115_v7 = vld [vmem:[%s437_s3 + $0x20] sm:$0xff]  ;;  %v25_v8 = vld [vmem:[%s438_s2 + $0x8] sm:$0xff]  ;;  %v114_v9 = vld [vmem:[%s437_s3 + $0x18] sm:$0xff]  ;;  %v206_v19 = vshrl.u32 %v205_v17, 7 }
   0x4   :  { %308 = vmatprep.subr.mxu1 %v117_v1  ;;  %297 = vmatprep.subr.mxu0 %v339_v2  ;;  %v24_v10 = vld [vmem:[%s438_s2] sm:$0xff]  ;;  %v113_v11 = vld [vmem:[%s437_s3 + $0x10] sm:$0xff]  ;;  %v112_v13 = vld [vmem:[%s437_s3 + $0x8] sm:$0xff] }
   0x5   :  { %309 = vmatpush3.msra.mxu1 %v117_v1  ;;  %298 = vmatpush3.msra.mxu0 %v26_v5  ;;  %v23_v12 = vld [vmem:[%s440_s0] sm:$0x3]  ;;  %v110_v15 = vld [vmem:[%s439_s1 + $0x8] sm:$0xff]  ;;  %v207_v24 = vsub.s32 0, %v206_v19  ;;  %v242_v25 = vsub.s32 1, %v206_v19 }
   0x6   :  { %310 = vmatprep.subr.mxu1 %v116_v3  ;;  %322 = vmatprep.mubr.msk.f32.mxu1 %vm119_vm1, %v109_v6  ;;  %v111_v14 = vld [vmem:[%s437_s3] sm:$0xff] }
   0x7   :  { %311 = vmatpush3.msra.mxu1 %v116_v3  ;;  %299 = vmatprep.subr.mxu0 %v339_v2  ;;  %v275_v21 = vld [vmem:[%s441_s4] ss:$0 sm:$0xff] }
   0x8   :  { %312 = vmatprep.subr.mxu1 %v115_v7  ;;  %300 = vmatpush3.msra.mxu0 %v25_v8  ;;  %v279_v32 = vld [vmem:[%s442_s5] ss:$0 sm:$0xff] }
   0x9   :  { %313 = vmatpush3.msra.mxu1 %v115_v7  ;;  %301 = vmatprep.subr.mxu0 %v339_v2 }
   0xa   :  { %314 = vmatprep.subr.mxu1 %v114_v9  ;;  %302 = vmatpush3.msra.mxu0 %v24_v10 }
   0xb   :  { %315 = vmatpush3.msra.mxu1 %v114_v9  ;;  %304 = vmatmul.mubr.msk.f32.vlgmr.msra.gmra.mxu0 %vm35_vm2, %v23_v12 }
   0xc   :  { %316 = vmatprep.subr.mxu1 %v113_v11 }
   0xd   :  { %317 = vmatpush3.msra.mxu1 %v113_v11 }
   0xe   :  { %318 = vmatprep.subr.mxu1 %v112_v13 }
   0xf   :  { %319 = vmatpush3.msra.mxu1 %v112_v13 }
  0x10   :  { %320 = vmatprep.subr.mxu1 %v111_v14 }
  0x11   :  { %321 = vmatpush3.msra.mxu1 %v111_v14 }
  0x12   :  { %323 = vmatmul.mubr.msk.f32.vlgmr.msra.gmra.mxu1 %vm119_vm1, %v110_v15 }
  0xcb   :  { %v105_v16 = vpop.f32.mrf.mxu0 }
  0xcc   :  { %v106_v23 = vadd.f32 %v275_v21, %v105_v16 }
  0xcd   :  { %v305_v18 = vpop.f32.mrf.mxu0 }
  0xce   :  { %v208_v26 = vrot.slane %v106_v23, %v207_v24  ;;  %v243_v27 = vrot.slane %v106_v23, %v242_v25 }
  0xd2   :  { %v324_v20 = vpop.f32.mrf.mxu1 }
  0xd3   :  { %202 = vst.msk [vmem:[#allocation2 + $0x8] sm:$0xff] %vm35_vm2, %v324_v20 }
  0xd4   :  { %v192_v22 = vpop.f32.mrf.mxu1 }
  0xd5   :  { %201 = vst.msk [vmem:[#allocation2] sm:$0xff] %vm35_vm2, %v192_v22 }
  0xdc   :  { %v204_v28 = vld [vmem:[#allocation2] ss:$2 sm:$0xff]  ;;  %v239_v29 = vld [vmem:[#allocation2 + $0x1] ss:$2 sm:$0xff] }
  0xdd   :  { %v209_v30 = vadd.f32 %v208_v26, %v204_v28  ;;  %v244_v31 = vadd.f32 %v243_v27, %v239_v29 }
  0xdf   :  { %327 = vtanh.f32 %v209_v30 }
  0xe0   :  { %329 = vtanh.f32 %v244_v31 }
  0xec   :  { %v328_v33 = vpop.eup %327 }
  0xed   :  { %v330_v34 = vpop.eup %329  ;;  %v217_v35 = vmul.f32 %v328_v33, %v279_v32 }
  0xee   :  { %v246_v37 = vmul.f32 %v330_v34, %v279_v32 }
  0xef   :  { %v218_v36 = vsel %vm35_vm2, %v217_v35, 0.0 }
  0xf0   :  { %219 = vadd.xlane.f32.xlu0 %v218_v36  ;;  %v247_v38 = vsel %vm35_vm2, %v246_v37, 0.0 }
  0xf4   :  { %248 = vadd.xlane.f32.xlu0 %v247_v38 }
 0x179   :  { %v220_v39 = vpop.xlane.xlu0 %219 }
 0x17a   :  { %v221_v40 = vrot.slane %v220_v39, 4 }
 0x17c   :  { %v222_v41 = vmax.f32 %v220_v39, %v221_v40 }
 0x17d   :  { %v249_v42 = vpop.xlane.xlu0 %248 }
 0x17e   :  { %v223_v43 = vrot.slane %v222_v41, 2  ;;  %v250_v44 = vrot.slane %v249_v42, 4 }
 0x180   :  { %v224_v45 = vmax.f32 %v222_v41, %v223_v43  ;;  %v251_v46 = vmax.f32 %v249_v42, %v250_v44 }
 0x182   :  { %v225_v47 = vrot.slane %v224_v45, 1  ;;  %v252_v48 = vrot.slane %v251_v46, 2 }
 0x184   :  { %v226_v49 = vmax.f32 %v224_v45, %v225_v47  ;;  %v253_v50 = vmax.f32 %v251_v46, %v252_v48 }
 0x186   :  { %v227_v51 = vsub.f32 %v220_v39, %v226_v49  ;;  %v254_v52 = vrot.slane %v253_v50, 1 }
 0x188   :  { %v228_v53 = vmul.f32 1.442695, %v227_v51  ;;  %v255_v54 = vmax.f32 %v253_v50, %v254_v52 }
 0x18a   :  { %331 = vpow2.f32 %v228_v53  ;;  %v256_v55 = vsub.f32 %v249_v42, %v255_v54 }
 0x18c   :  { %v257_v56 = vmul.f32 1.442695, %v256_v55 }
 0x18e   :  { %333 = vpow2.f32 %v257_v56 }
 0x197   :  { %v332_v57 = vpop.eup %331 }
 0x198   :  { %v230_v58 = vrot.slane %v332_v57, 4 }
 0x19a   :  { %v231_v59 = vadd.f32 %v332_v57, %v230_v58 }
 0x19b   :  { %v334_v60 = vpop.eup %333 }
 0x19c   :  { %v232_v61 = vrot.slane %v231_v59, 2  ;;  %v259_v62 = vrot.slane %v334_v60, 4 }
 0x19e   :  { %v233_v63 = vadd.f32 %v232_v61, %v231_v59  ;;  %v260_v0 = vadd.f32 %v334_v60, %v259_v62 }
 0x1a0   :  { %v234_v1 = vrot.slane %v233_v63, 1  ;;  %v261_v2 = vrot.slane %v260_v0, 2 }
 0x1a2   :  { %v235_v3 = vadd.f32 %v234_v1, %v233_v63  ;;  %v262_v4 = vadd.f32 %v261_v2, %v260_v0 }
 0x1a4   :  { %v263_v5 = vrot.slane %v262_v4, 1  ;;  %335 = vrcp.f32 %v235_v3 }
 0x1a6   :  { %v264_v6 = vadd.f32 %v263_v5, %v262_v4 }
 0x1a8   :  { %337 = vrcp.f32 %v264_v6 }
 0x1b1   :  { %v336_v7 = vpop.eup %335 }
 0x1b2   :  { %v237_v9 = vmul.f32 %v336_v7, %v332_v57 }
 0x1b5   :  { %v338_v8 = vpop.eup %337 }
 0x1b6   :  { %v266_v10 = vmul.f32 %v338_v8, %v334_v60 }
 0x1b8   :  { %v268_v11 = vsel %vm267_vm3, %v237_v9, %v266_v10 }
 0x1b9   :  { %270 = vst.msk [vmem:[%s443_s6] sm:$0xff] %vm269_vm4, %v268_v11 }

</bundles_post_ra>
